<compile_context>
chip_gen: v6e
topology: v6e:2x2x1
jax: 0.10.0
libtpu: 0.0.40
codegen_flags: <defaults>
</compile_context>

<pallas_src>
import math

import jax
import jax.numpy as jnp
from jax import lax
from jax.experimental import pallas as pl
from jax.experimental.pallas import tpu as pltpu

_SQRT_2_OVER_PI = math.sqrt(2.0 / math.pi)


def _gelu_tanh(x):
    # torch.nn.functional.gelu(x, approximate='tanh')
    return 0.5 * x * (1.0 + jnp.tanh(_SQRT_2_OVER_PI * (x + 0.044715 * x * x * x)))


def _round_up(v, m):
    return ((v + m - 1) // m) * m


def gemma_mlp_kernel(x_ref, wg_ref, wu_ref, wd_ref, o_ref, acc_ref):
    # x_ref:  (tm, H)   token tile
    # wg_ref: (ti, H)   gate_proj rows [j*ti : (j+1)*ti]   (PyTorch (out, in))
    # wu_ref: (ti, H)   up_proj rows
    # wd_ref: (H, ti)   down_proj columns
    # o_ref:  (tm, H)
    # acc_ref:(tm, H)   f32 accumulator (persists across the reduction axis)
    j = pl.program_id(1)

    @pl.when(j == 0)
    def _():
        acc_ref[...] = jnp.zeros_like(acc_ref)

    x = x_ref[...]
    # Contract on in_features (dim 1 of both operands): x @ W^T without any
    # wrapper-side transpose of the PyTorch-layout weights.
    dn = (((1,), (1,)), ((), ()))
    gate = lax.dot_general(x, wg_ref[...], dn, preferred_element_type=jnp.float32)
    up = lax.dot_general(x, wu_ref[...], dn, preferred_element_type=jnp.float32)

    # Elementwise path stays in f32 (matches reference numerics; v5e has no
    # bf16 VPU/EUP anyway).
    z = _gelu_tanh(gate) * up  # (tm, ti), f32

    # Partial down-proj: z @ Wd[:, j*ti:(j+1)*ti]^T, accumulated in f32.
    acc_ref[...] += lax.dot_general(
        z.astype(wd_ref.dtype), wd_ref[...], dn,
        preferred_element_type=jnp.float32)

    @pl.when(j == pl.num_programs(1) - 1)
    def _():
        o_ref[...] = acc_ref[...].astype(o_ref.dtype)


def gemma_mlp(x, w_gate, w_up, w_down, *, tm=256, ti=512):
    """x: (B, S, H); weights in PyTorch (out_features, in_features) layout."""
    B, S, H = x.shape
    I = w_gate.shape[0]
    assert w_gate.shape == (I, H)
    assert w_up.shape == (I, H)
    assert w_down.shape == (H, I)

    M = B * S
    x2d = x.reshape(M, H)

    # Token tile: multiple of the sublane pack (16 for 2-byte dtypes), clamped
    # to the (rounded-up) number of tokens.
    pack = 16 if jnp.dtype(x.dtype).itemsize == 2 else 8
    tm = max(pack, min(_round_up(tm, pack), _round_up(M, pack)))

    # Reduction tile: must divide I exactly (a partial reduction block would
    # feed stale VMEM into the accumulator).
    ti = min(ti, I)
    while I % ti:
        ti //= 2
    assert ti >= 1 and I % ti == 0

    grid = (pl.cdiv(M, tm), I // ti)

    # Scoped-VMEM budget: double-buffered x/out + streamed weight tiles + acc.
    a_bytes = jnp.dtype(x.dtype).itemsize
    w_bytes = jnp.dtype(w_gate.dtype).itemsize
    vmem_est = (
        2 * tm * H * a_bytes        # x, double-buffered
        + 4 * ti * H * w_bytes      # gate + up tiles, double-buffered
        + 2 * H * ti * w_bytes      # down tile, double-buffered
        + 2 * tm * H * a_bytes      # output, double-buffered
        + tm * H * 4                # f32 accumulator scratch
    )
    vmem_limit = int(min(max(2 * vmem_est, 32 * 1024 * 1024), 96 * 1024 * 1024))

    out2d = pl.pallas_call(
        gemma_mlp_kernel,
        out_shape=jax.ShapeDtypeStruct((M, H), x.dtype),
        grid_spec=pltpu.PrefetchScalarGridSpec(
            num_scalar_prefetch=0,
            grid=grid,
            in_specs=[
                pl.BlockSpec((tm, H), lambda i, j: (i, 0)),   # x tile
                pl.BlockSpec((ti, H), lambda i, j: (j, 0)),   # gate_proj rows
                pl.BlockSpec((ti, H), lambda i, j: (j, 0)),   # up_proj rows
                pl.BlockSpec((H, ti), lambda i, j: (0, j)),   # down_proj cols
            ],
            out_specs=pl.BlockSpec((tm, H), lambda i, j: (i, 0)),
            scratch_shapes=[pltpu.VMEM((tm, H), jnp.float32)],
        ),
        compiler_params=pltpu.CompilerParams(
            dimension_semantics=("parallel", "arbitrary"),
            vmem_limit_bytes=vmem_limit,
        ),
    )(x2d, w_gate, w_up, w_down)

    return out2d.reshape(B, S, H)


def gemma_mlp_ref(x, w_gate, w_up, w_down):
    y = _gelu_tanh(jnp.einsum("bsh,ih->bsi", x, w_gate))
    j = jnp.einsum("bsh,ih->bsi", x, w_up)
    z = y * j
    return jnp.einsum("bsi,hi->bsh", z, w_down)


if __name__ == "__main__":
    # Small shapes consistent with the module: hidden_size=128, intermediate=256.
    B, S, H, I = 2, 8, 128, 256

    key = jax.random.PRNGKey(0)
    kx, kg, ku, kd = jax.random.split(key, 4)

    x = jax.random.normal(kx, (B, S, H), dtype=jnp.float32)
    # Deterministic synthetic weights, PyTorch (out_features, in_features) layout.
    w_gate = jax.random.normal(kg, (I, H), dtype=jnp.float32) * 0.02
    w_up = jax.random.normal(ku, (I, H), dtype=jnp.float32) * 0.02
    w_down = jax.random.normal(kd, (H, I), dtype=jnp.float32) * 0.02

    # f32 path: tight correctness check vs. reference.
    out = jax.block_until_ready(gemma_mlp(x, w_gate, w_up, w_down))
    ref = gemma_mlp_ref(x, w_gate, w_up, w_down)
    assert out.shape == (B, S, H)
    assert jnp.allclose(out, ref, atol=1e-4, rtol=1e-4)

    # bf16 MXU fast path: smoke-test with loose tolerance vs. the f32 reference.
    xb = x.astype(jnp.bfloat16)
    wgb = w_gate.astype(jnp.bfloat16)
    wub = w_up.astype(jnp.bfloat16)
    wdb = w_down.astype(jnp.bfloat16)
    out_bf16 = jax.block_until_ready(gemma_mlp(xb, wgb, wub, wdb))
    assert out_bf16.shape == (B, S, H)
    assert float(jnp.max(jnp.abs(out_bf16.astype(jnp.float32) - ref))) < 5e-2

    print("KERNEL_OK")
</pallas_src>

<mosaic_0001>
module attributes {stable_mosaic.version = 11 : i64} {
  func.func @gemma_mlp_kernel(%arg0: i32, %arg1: i32, %arg2: memref<16x128xf32, #tpu.memory_space<vmem>>, %arg3: memref<256x128xf32, #tpu.memory_space<vmem>>, %arg4: memref<256x128xf32, #tpu.memory_space<vmem>>, %arg5: memref<128x256xf32, #tpu.memory_space<vmem>>, %arg6: memref<16x128xf32, #tpu.memory_space<vmem>>, %arg7: memref<16x128xf32, #tpu.memory_space<vmem>>) attributes {dimension_semantics = [#tpu.dimension_semantics<parallel>, #tpu.dimension_semantics<arbitrary>], iteration_bounds = array<i64: 1, 1>, scalar_prefetch = 0 : i64, scratch_operands = 1 : i64, tpu.core_type = #tpu.core_type<tc>, window_params = [{transform_indices = @transform_0, window_bounds = array<i64: 16, 128>}, {transform_indices = @transform_1, window_bounds = array<i64: 256, 128>}, {transform_indices = @transform_2, window_bounds = array<i64: 256, 128>}, {transform_indices = @transform_3, window_bounds = array<i64: 128, 256>}, {transform_indices = @transform_4, window_bounds = array<i64: 16, 128>}]} {
    %c0_i32 = arith.constant 0 : i32
    %0 = arith.cmpi eq, %arg1, %c0_i32 : i32
    %1 = arith.extui %0 : i1 to i32
    %c0_i32_0 = arith.constant 0 : i32
    %2 = arith.cmpi ne, %1, %c0_i32_0 : i32
    scf.if %2 {
      %cst_20 = arith.constant 0.000000e+00 : f32
      %30 = vector.broadcast %cst_20 : f32 to vector<16x128xf32>
      %c0_21 = arith.constant 0 : index
      %c0_22 = arith.constant 0 : index
      %31 = vector.load %arg7[%c0_21, %c0_22] : memref<16x128xf32, #tpu.memory_space<vmem>>, vector<16x128xf32>
      tpu.vector_store %arg7[%c0_21, %c0_22], %30 {strides = array<i32>} : memref<16x128xf32, #tpu.memory_space<vmem>>, vector<16x128xf32>,
    } else {
    }
    %c0 = arith.constant 0 : index
    %c0_1 = arith.constant 0 : index
    %3 = vector.load %arg2[%c0, %c0_1] : memref<16x128xf32, #tpu.memory_space<vmem>>, vector<16x128xf32>
    %c0_2 = arith.constant 0 : index
    %c0_3 = arith.constant 0 : index
    %4 = vector.load %arg3[%c0_2, %c0_3] : memref<256x128xf32, #tpu.memory_space<vmem>>, vector<256x128xf32>
    %cst = arith.constant dense<0.000000e+00> : vector<16x256xf32>
    %5 = tpu.matmul %3, %4, %cst {dimension_numbers = #tpu.dot_dimension_numbers<[1], [1], [0], [0], [0, 0, 1, 0], [], []>} : vector<16x128xf32>, vector<256x128xf32>, vector<16x256xf32> -> vector<16x256xf32>
    %c0_4 = arith.constant 0 : index
    %c0_5 = arith.constant 0 : index
    %6 = vector.load %arg4[%c0_4, %c0_5] : memref<256x128xf32, #tpu.memory_space<vmem>>, vector<256x128xf32>
    %cst_6 = arith.constant dense<0.000000e+00> : vector<16x256xf32>
    %7 = tpu.matmul %3, %6, %cst_6 {dimension_numbers = #tpu.dot_dimension_numbers<[1], [1], [0], [0], [0, 0, 1, 0], [], []>} : vector<16x128xf32>, vector<256x128xf32>, vector<16x256xf32> -> vector<16x256xf32>
    %cst_7 = arith.constant 5.000000e-01 : f32
    %8 = vector.broadcast %cst_7 : f32 to vector<16x256xf32>
    %9 = arith.mulf %8, %5 : vector<16x256xf32>
    %cst_8 = arith.constant 4.471500e-02 : f32
    %10 = vector.broadcast %cst_8 : f32 to vector<16x256xf32>
    %11 = arith.mulf %10, %5 : vector<16x256xf32>
    %12 = arith.mulf %11, %5 : vector<16x256xf32>
    %13 = arith.mulf %12, %5 : vector<16x256xf32>
    %14 = arith.addf %5, %13 : vector<16x256xf32>
    %cst_9 = arith.constant 0.797884583 : f32
    %15 = vector.broadcast %cst_9 : f32 to vector<16x256xf32>
    %16 = arith.mulf %15, %14 : vector<16x256xf32>
    %17 = math.tanh %16 : vector<16x256xf32>
    %cst_10 = arith.constant 1.000000e+00 : f32
    %18 = vector.broadcast %cst_10 : f32 to vector<16x256xf32>
    %19 = arith.addf %18, %17 : vector<16x256xf32>
    %20 = arith.mulf %9, %19 : vector<16x256xf32>
    %21 = arith.mulf %20, %7 : vector<16x256xf32>
    %c0_11 = arith.constant 0 : index
    %c0_12 = arith.constant 0 : index
    %22 = vector.load %arg7[%c0_11, %c0_12] : memref<16x128xf32, #tpu.memory_space<vmem>>, vector<16x128xf32>
    %c0_13 = arith.constant 0 : index
    %c0_14 = arith.constant 0 : index
    %23 = vector.load %arg5[%c0_13, %c0_14] : memref<128x256xf32, #tpu.memory_space<vmem>>, vector<128x256xf32>
    %cst_15 = arith.constant dense<0.000000e+00> : vector<16x128xf32>
    %24 = tpu.matmul %21, %23, %cst_15 {dimension_numbers = #tpu.dot_dimension_numbers<[1], [1], [0], [0], [0, 0, 1, 0], [], []>} : vector<16x256xf32>, vector<128x256xf32>, vector<16x128xf32> -> vector<16x128xf32>
    %25 = arith.addf %22, %24 : vector<16x128xf32>
    %c0_16 = arith.constant 0 : index
    %c0_17 = arith.constant 0 : index
    %26 = vector.load %arg7[%c0_16, %c0_17] : memref<16x128xf32, #tpu.memory_space<vmem>>, vector<16x128xf32>
    tpu.vector_store %arg7[%c0_16, %c0_17], %25 {strides = array<i32>} : memref<16x128xf32, #tpu.memory_space<vmem>>, vector<16x128xf32>,
    %c0_i32_18 = arith.constant 0 : i32
    %27 = arith.cmpi eq, %arg1, %c0_i32_18 : i32
    %28 = arith.extui %27 : i1 to i32
    %c0_i32_19 = arith.constant 0 : i32
    %29 = arith.cmpi ne, %28, %c0_i32_19 : i32
    scf.if %29 {
      %c0_20 = arith.constant 0 : index
      %c0_21 = arith.constant 0 : index
      %30 = vector.load %arg7[%c0_20, %c0_21] : memref<16x128xf32, #tpu.memory_space<vmem>>, vector<16x128xf32>
      %c0_22 = arith.constant 0 : index
      %c0_23 = arith.constant 0 : index
      %31 = vector.load %arg6[%c0_22, %c0_23] : memref<16x128xf32, #tpu.memory_space<vmem>>, vector<16x128xf32>
      tpu.vector_store %arg6[%c0_22, %c0_23], %30 {strides = array<i32>} : memref<16x128xf32, #tpu.memory_space<vmem>>, vector<16x128xf32>,
    } else {
    }
    return
  }
  func.func @transform_0(%arg0: i32, %arg1: i32) -> (i32, i32) {
    %c0_i32 = arith.constant 0 : i32
    %c0_i32_0 = arith.constant 0 : i32
    return %arg0, %c0_i32 : i32, i32
  }
  func.func @transform_1(%arg0: i32, %arg1: i32) -> (i32, i32) {
    %c0_i32 = arith.constant 0 : i32
    %c0_i32_0 = arith.constant 0 : i32
    return %arg1, %c0_i32 : i32, i32
  }
  func.func @transform_2(%arg0: i32, %arg1: i32) -> (i32, i32) {
    %c0_i32 = arith.constant 0 : i32
    %c0_i32_0 = arith.constant 0 : i32
    return %arg1, %c0_i32 : i32, i32
  }
  func.func @transform_3(%arg0: i32, %arg1: i32) -> (i32, i32) {
    %c0_i32 = arith.constant 0 : i32
    %c0_i32_0 = arith.constant 0 : i32
    return %c0_i32, %arg1 : i32, i32
  }
  func.func @transform_4(%arg0: i32, %arg1: i32) -> (i32, i32) {
    %c0_i32 = arith.constant 0 : i32
    %c0_i32_0 = arith.constant 0 : i32
    return %arg0, %c0_i32 : i32, i32
  }
}

</mosaic_0001>

<bundles_post_ra>
// kernel: tpu_custom_call.1
= control target key start
LH: loop header
LB: loop body
LE: loop exit
PB: predicated region body
PF: predicated region fallthrough
CT: control target
= control target key end

     0   :  { %9 = vsyncpa [#allocation4], 0  ;;  %s774_s0 = inlined_call_operand.hbm [shape: f32[16,128], index: 0, kind: input, shape index: {}]   ;;  %s775_s1 = inlined_call_operand.hbm [shape: f32[256,128], index: 1, kind: input, shape index: {}]   ;;  %s776_s2 = inlined_call_operand.hbm [shape: f32[256,128], index: 2, kind: input, shape index: {}]   ;;  %s777_s3 = inlined_call_operand.hbm [shape: f32[128,256], index: 3, kind: input, shape index: {}]   ;;  %s778_s4 = inlined_call_operand.hbm [shape: f32[16,128], index: 4, kind: output, shape index: {}]  }
   0x1   :  { %10 = vsyncpa [#allocation7], 0 }
   0x2   :  { %11 = vsyncpa [#allocation10], 0 }
   0x3   :  { %12 = vsyncpa [#allocation5], 0  ;;  %s707_s15 = smov [#allocation6]   ;;  %s708_s17 = smov [#allocation3]  }
   0x4   :  { %s30_s16 = sshll.u32 %s707_s15, 4  ;;  %s18_s18 = sshll.u32 %s708_s17, 4  ;;  %s31_s16 = int_to_ptr.vmem [resolvable:$true] %s30_s16  ;;  %s19_s18 = int_to_ptr.vmem [resolvable:$true] %s18_s18 }
   0x5   :  { %s607_s19 = scalar_lea.vmem %s31_s16, 4096  ;;  %p612_p1 = scmp.lt.s32.totalorder %s31_s16, %s31_s16 }
   0x6   :  { %p608_p0 = scmp.ne.s32.totalorder %s31_s16, %s607_s19  ;;  %p613_p2 = scmp.lt.s32.totalorder %s607_s19, %s607_s19 }
   0x8   :  { %p614_p3 = por %p613_p2, %p612_p1 }
   0xa   :  { %p615_p4 = pnand %p614_p3, %p608_p0 }
   0xc   :  { %618 = shalt.err (!%p615_p4)
}
   0xd   :  { %s709_s20 = smov 128   ;;  %s710_s21 = smov 8  }
   0xe   :  { %36 = dma.hbm_to_vmem [thread:$0]  %s775_s1, 4096, %s31_s16, [#allocation7], %s709_s20, %s709_s20, %s710_s21  }
   0xf   :  { %s627_s24 = scalar_lea.vmem %s19_s18, 256  ;;  %p632_p6 = scmp.lt.s32.totalorder %s19_s18, %s19_s18 }
  0x10   :  { %p628_p5 = scmp.ne.s32.totalorder %s19_s18, %s627_s24  ;;  %p633_p7 = scmp.lt.s32.totalorder %s627_s24, %s627_s24 }
  0x12   :  { %p634_p8 = por %p633_p7, %p632_p6 }
  0x14   :  { %p635_p9 = pnand %p634_p8, %p628_p5 }
  0x16   :  { %638 = shalt.err (!%p635_p9)
}
  0x17   :  { %24 = dma.hbm_to_vmem [thread:$0]  %s774_s0, 256, %s19_s18, [#allocation4], %s709_s20, %s709_s20, %s710_s21  }
  0x18   :  { %s711_s27 = smov [#allocation8]   ;;  %s712_s29 = smov [#allocation9]  }
  0x19   :  { %s42_s28 = sshll.u32 %s711_s27, 4  ;;  %s54_s30 = sshll.u32 %s712_s29, 4  ;;  %s43_s28 = int_to_ptr.vmem [resolvable:$true] %s42_s28  ;;  %s55_s30 = int_to_ptr.vmem [resolvable:$true] %s54_s30 }
  0x1a   :  { %s647_s1 = scalar_lea.vmem %s43_s28, 4096  ;;  %p652_p11 = scmp.lt.s32.totalorder %s43_s28, %s43_s28 }
  0x1b   :  { %p648_p10 = scmp.ne.s32.totalorder %s43_s28, %s647_s1  ;;  %p653_p12 = scmp.lt.s32.totalorder %s647_s1, %s647_s1 }
  0x1d   :  { %p654_p13 = por %p653_p12, %p652_p11 }
  0x1f   :  { %p655_p0 = pnand %p654_p13, %p648_p10 }
  0x21   :  { %658 = shalt.err (!%p655_p0)
}
  0x22   :  { %48 = dma.hbm_to_vmem [thread:$0]  %s776_s2, 4096, %s43_s28, [#allocation7], %s709_s20, %s709_s20, %s710_s21  }
  0x23   :  { %s667_s0 = scalar_lea.vmem %s55_s30, 4096  ;;  %p672_p2 = scmp.lt.s32.totalorder %s55_s30, %s55_s30 }
  0x24   :  { %p668_p1 = scmp.ne.s32.totalorder %s55_s30, %s667_s0  ;;  %p673_p3 = scmp.lt.s32.totalorder %s667_s0, %s667_s0 }
  0x26   :  { %p674_p4 = por %p673_p3, %p672_p2 }
  0x28   :  { %p675_p5 = pnand %p674_p4, %p668_p1 }
  0x2a   :  { %678 = shalt.err (!%p675_p5)
}
  0x2b   :  { %s713_s7 = smov 256   ;;  %s714_s8 = smov 16  }
  0x2c   :  { %60 = dma.hbm_to_vmem [thread:$0]  %s777_s3, 4096, %s55_s30, [#allocation10], %s713_s7, %s713_s7, %s714_s8  }
  0x2d   :  { %699 = dma.done.wait [#allocation4], 256  }
  0x2e   :  { %700 = vsyncadd [#allocation4], 4294967040 }
  0x2f   :  { %701 = dma.done.wait [#allocation7], 8192  }
  0x30   :  { %702 = vsyncadd [#allocation7], 4294959104 }
  0x31   :  { %703 = dma.done.wait [#allocation10], 4096  }
  0x32   :  { %704 = vsyncadd [#allocation10], 4294963200  ;;  %v112_v0 = vld [vmem:[#allocation6 + $0xf8] sm:$0xff]  ;;  %v111_v2 = vld [vmem:[#allocation6 + $0xf0] sm:$0xff]  ;;  %s715_s2 = smov [#allocation11]  }
  0x33   :  { %v96_v1 = vld [vmem:[#allocation6 + $0x78] sm:$0xff]  ;;  %478 = vmatprep.subr.mxu0 %v112_v0  ;;  %v95_v3 = vld [vmem:[#allocation6 + $0x70] sm:$0xff]  ;;  %v110_v4 = vld [vmem:[#allocation6 + $0xe8] sm:$0xff]  ;;  %s464_s3 = sshll.u32 %s715_s2, 4  ;;  %s465_s3 = int_to_ptr.vmem [resolvable:$true] %s464_s3 }
  0x34   :  { %479 = vmatpush3.xpose.msra.mxu0 %v96_v1  ;;  %v221_v5 = vld [vmem:[#allocation8 + $0xf8] sm:$0xff]  ;;  %v220_v7 = vld [vmem:[#allocation8 + $0xf0] sm:$0xff]  ;;  %v94_v8 = vld [vmem:[#allocation6 + $0x68] sm:$0xff]  ;;  %s679_s11 = scalar_lea.vmem %s465_s3, 256  ;;  %p684_p7 = scmp.lt.s32.totalorder %s465_s3, %s465_s3 }
  0x35   :  { %480 = vmatprep.subr.mxu0 %v111_v2  ;;  %514 = vmatprep.subr.mxu1 %v221_v5  ;;  %v205_v6 = vld [vmem:[#allocation8 + $0x78] sm:$0xff]  ;;  %v204_v9 = vld [vmem:[#allocation8 + $0x70] sm:$0xff]  ;;  %v109_v10 = vld [vmem:[#allocation6 + $0xe0] sm:$0xff]  ;;  %p680_p6 = scmp.ne.s32.totalorder %s465_s3, %s679_s11  ;;  %p685_p8 = scmp.lt.s32.totalorder %s679_s11, %s679_s11 }
  0x36   :  { %515 = vmatpush3.xpose.msra.mxu1 %v205_v6  ;;  %v219_v11 = vld [vmem:[#allocation8 + $0xe8] sm:$0xff]  ;;  %v93_v12 = vld [vmem:[#allocation6 + $0x60] sm:$0xff]  ;;  %v108_v14 = vld [vmem:[#allocation6 + $0xd8] sm:$0xff] }
  0x37   :  { %516 = vmatprep.subr.mxu1 %v220_v7  ;;  %v203_v13 = vld [vmem:[#allocation8 + $0x68] sm:$0xff]  ;;  %v218_v15 = vld [vmem:[#allocation8 + $0xe0] sm:$0xff]  ;;  %v92_v16 = vld [vmem:[#allocation6 + $0x58] sm:$0xff]  ;;  %p686_p9 = por %p685_p8, %p684_p7 }
  0x38   :  { %481 = vmatpush3.xpose.msra.mxu0 %v95_v3  ;;  %v202_v17 = vld [vmem:[#allocation8 + $0x60] sm:$0xff]  ;;  %v107_v18 = vld [vmem:[#allocation6 + $0xd0] sm:$0xff]  ;;  %v217_v19 = vld [vmem:[#allocation8 + $0xd8] sm:$0xff] }
  0x39   :  { %482 = vmatprep.subr.mxu0 %v110_v4  ;;  %v762_v20 = vld [vmem:[#allocation3] sm:$0xff]  ;;  %v201_v22 = vld [vmem:[#allocation8 + $0x58] sm:$0xff]  ;;  %v106_v23 = vld [vmem:[#allocation6 + $0xc8] sm:$0xff]  ;;  %p687_p10 = pnand %p686_p9, %p680_p6 }
  0x3a   :  { %517 = vmatpush3.xpose.msra.mxu1 %v204_v9  ;;  %v91_v21 = vld [vmem:[#allocation6 + $0x50] sm:$0xff]  ;;  %510 = vmatprep.mubr.f32.mxu0 %v762_v20  ;;  %v90_v25 = vld [vmem:[#allocation6 + $0x48] sm:$0xff]  ;;  %v105_v27 = vld [vmem:[#allocation6 + $0xc0] sm:$0xff] }
  0x3b   :  { %518 = vmatprep.subr.mxu1 %v219_v11  ;;  %v216_v24 = vld [vmem:[#allocation8 + $0xd0] sm:$0xff]  ;;  %546 = vmatprep.mubr.f32.mxu1 %v762_v20  ;;  %v215_v28 = vld [vmem:[#allocation8 + $0xc8] sm:$0xff]  ;;  %v89_v29 = vld [vmem:[#allocation6 + $0x40] sm:$0xff] }
  0x3c   :  { %483 = vmatpush3.xpose.msra.mxu0 %v94_v8  ;;  %v200_v26 = vld [vmem:[#allocation8 + $0x50] sm:$0xff]  ;;  %v199_v30 = vld [vmem:[#allocation8 + $0x48] sm:$0xff]  ;;  %v104_v31 = vld [vmem:[#allocation6 + $0xb8] sm:$0xff] }
  0x3d   :  { %484 = vmatprep.subr.mxu0 %v109_v10  ;;  %v214_v32 = vld [vmem:[#allocation8 + $0xc0] sm:$0xff]  ;;  %v88_v33 = vld [vmem:[#allocation6 + $0x38] sm:$0xff]  ;;  %v103_v35 = vld [vmem:[#allocation6 + $0xb0] sm:$0xff] }
  0x3e   :  { %519 = vmatpush3.xpose.msra.mxu1 %v203_v13  ;;  %v198_v34 = vld [vmem:[#allocation8 + $0x40] sm:$0xff]  ;;  %v213_v36 = vld [vmem:[#allocation8 + $0xb8] sm:$0xff]  ;;  %v87_v37 = vld [vmem:[#allocation6 + $0x30] sm:$0xff] }
  0x3f   :  { %520 = vmatprep.subr.mxu1 %v218_v15  ;;  %v197_v38 = vld [vmem:[#allocation8 + $0x38] sm:$0xff]  ;;  %v102_v39 = vld [vmem:[#allocation6 + $0xa8] sm:$0xff]  ;;  %v212_v40 = vld [vmem:[#allocation8 + $0xb0] sm:$0xff] }
  0x40   :  { %485 = vmatpush3.xpose.msra.mxu0 %v93_v12  ;;  %v86_v41 = vld [vmem:[#allocation6 + $0x28] sm:$0xff]  ;;  %v196_v42 = vld [vmem:[#allocation8 + $0x30] sm:$0xff]  ;;  %v101_v43 = vld [vmem:[#allocation6 + $0xa0] sm:$0xff] }
  0x41   :  { %486 = vmatprep.subr.mxu0 %v108_v14  ;;  %v211_v44 = vld [vmem:[#allocation8 + $0xa8] sm:$0xff]  ;;  %v85_v45 = vld [vmem:[#allocation6 + $0x20] sm:$0xff]  ;;  %v100_v47 = vld [vmem:[#allocation6 + $0x98] sm:$0xff] }
  0x42   :  { %521 = vmatpush3.xpose.msra.mxu1 %v202_v17  ;;  %v195_v46 = vld [vmem:[#allocation8 + $0x28] sm:$0xff]  ;;  %v210_v48 = vld [vmem:[#allocation8 + $0xa0] sm:$0xff]  ;;  %v84_v49 = vld [vmem:[#allocation6 + $0x18] sm:$0xff] }
  0x43   :  { %522 = vmatprep.subr.mxu1 %v217_v19  ;;  %v194_v50 = vld [vmem:[#allocation8 + $0x20] sm:$0xff]  ;;  %v99_v51 = vld [vmem:[#allocation6 + $0x90] sm:$0xff]  ;;  %v209_v52 = vld [vmem:[#allocation8 + $0x98] sm:$0xff] }
  0x44   :  { %487 = vmatpush3.xpose.msra.mxu0 %v92_v16  ;;  %v83_v53 = vld [vmem:[#allocation6 + $0x10] sm:$0xff]  ;;  %v193_v54 = vld [vmem:[#allocation8 + $0x18] sm:$0xff]  ;;  %v98_v55 = vld [vmem:[#allocation6 + $0x88] sm:$0xff] }
  0x45   :  { %488 = vmatprep.subr.mxu0 %v107_v18  ;;  %v208_v56 = vld [vmem:[#allocation8 + $0x90] sm:$0xff]  ;;  %v82_v57 = vld [vmem:[#allocation6 + $0x8] sm:$0xff]  ;;  %v97_v59 = vld [vmem:[#allocation6 + $0x80] sm:$0xff] }
  0x46   :  { %523 = vmatpush3.xpose.msra.mxu1 %v201_v22  ;;  %v192_v58 = vld [vmem:[#allocation8 + $0x10] sm:$0xff]  ;;  %v207_v60 = vld [vmem:[#allocation8 + $0x88] sm:$0xff]  ;;  %v81_v61 = vld [vmem:[#allocation6] sm:$0xff] }
  0x47   :  { %524 = vmatprep.subr.mxu1 %v216_v24  ;;  %v191_v62 = vld [vmem:[#allocation8 + $0x8] sm:$0xff]  ;;  %v206_v63 = vld [vmem:[#allocation8 + $0x80] sm:$0xff]  ;;  %v372_v0 = vld [vmem:[#allocation9 + $0xf8] sm:$0xff] }
  0x48   :  { %489 = vmatpush3.xpose.msra.mxu0 %v91_v21  ;;  %v80_v1 = vld [vmem:[#allocation3 + $0x8] sm:$0xff]  ;;  %v190_v2 = vld [vmem:[#allocation8] sm:$0xff]  ;;  %v371_v3 = vld [vmem:[#allocation9 + $0xf0] sm:$0xff] }
  0x49   :  { %490 = vmatprep.subr.mxu0 %v106_v23  ;;  %v370_v4 = vld [vmem:[#allocation9 + $0xe8] sm:$0xff]  ;;  %v369_v5 = vld [vmem:[#allocation9 + $0xe0] sm:$0xff]  ;;  %v368_v6 = vld [vmem:[#allocation9 + $0xd8] sm:$0xff] }
  0x4a   :  { %525 = vmatpush3.xpose.msra.mxu1 %v200_v26  ;;  %v367_v7 = vld [vmem:[#allocation9 + $0xd0] sm:$0xff]  ;;  %v366_v8 = vld [vmem:[#allocation9 + $0xc8] sm:$0xff]  ;;  %v365_v9 = vld [vmem:[#allocation9 + $0xc0] sm:$0xff] }
  0x4b   :  { %526 = vmatprep.subr.mxu1 %v215_v28  ;;  %v364_v10 = vld [vmem:[#allocation9 + $0xb8] sm:$0xff]  ;;  %v363_v11 = vld [vmem:[#allocation9 + $0xb0] sm:$0xff]  ;;  %v362_v12 = vld [vmem:[#allocation9 + $0xa8] sm:$0xff] }
  0x4c   :  { %491 = vmatpush3.xpose.msra.mxu0 %v90_v25  ;;  %v361_v13 = vld [vmem:[#allocation9 + $0xa0] sm:$0xff]  ;;  %v360_v14 = vld [vmem:[#allocation9 + $0x98] sm:$0xff]  ;;  %v359_v15 = vld [vmem:[#allocation9 + $0x90] sm:$0xff] }
  0x4d   :  { %492 = vmatprep.subr.mxu0 %v105_v27  ;;  %v358_v16 = vld [vmem:[#allocation9 + $0x88] sm:$0xff]  ;;  %v357_v17 = vld [vmem:[#allocation9 + $0x80] sm:$0xff]  ;;  %v356_v18 = vld [vmem:[#allocation9 + $0x78] sm:$0xff] }
  0x4e   :  { %527 = vmatpush3.xpose.msra.mxu1 %v199_v30  ;;  %v355_v19 = vld [vmem:[#allocation9 + $0x70] sm:$0xff]  ;;  %v353_v21 = vld [vmem:[#allocation9 + $0x60] sm:$0xff]  ;;  %v352_v22 = vld [vmem:[#allocation9 + $0x58] sm:$0xff] }
  0x4f   :  { %528 = vmatprep.subr.mxu1 %v214_v32  ;;  %v351_v23 = vld [vmem:[#allocation9 + $0x50] sm:$0xff]  ;;  %v350_v24 = vld [vmem:[#allocation9 + $0x48] sm:$0xff]  ;;  %v349_v25 = vld [vmem:[#allocation9 + $0x40] sm:$0xff] }
  0x50   :  { %493 = vmatpush3.xpose.msra.mxu0 %v89_v29  ;;  %v348_v26 = vld [vmem:[#allocation9 + $0x38] sm:$0xff]  ;;  %v347_v27 = vld [vmem:[#allocation9 + $0x30] sm:$0xff]  ;;  %v346_v28 = vld [vmem:[#allocation9 + $0x28] sm:$0xff] }
  0x51   :  { %494 = vmatprep.subr.mxu0 %v104_v31  ;;  %v345_v29 = vld [vmem:[#allocation9 + $0x20] sm:$0xff]  ;;  %v344_v30 = vld [vmem:[#allocation9 + $0x18] sm:$0xff]  ;;  %v343_v31 = vld [vmem:[#allocation9 + $0x10] sm:$0xff] }
  0x52   :  { %529 = vmatpush3.xpose.msra.mxu1 %v198_v34  ;;  %v342_v32 = vld [vmem:[#allocation9 + $0x8] sm:$0xff] }
  0x53   :  { %530 = vmatprep.subr.mxu1 %v213_v36 }
  0x54   :  { %495 = vmatpush3.xpose.msra.mxu0 %v88_v33  ;;  %v341_v33 = vld [vmem:[#allocation9] sm:$0xff] }
  0x55   :  { %496 = vmatprep.subr.mxu0 %v103_v35 }
  0x56   :  { %531 = vmatpush3.xpose.msra.mxu1 %v197_v38 }
  0x57   :  { %532 = vmatprep.subr.mxu1 %v212_v40 }
  0x58   :  { %497 = vmatpush3.xpose.msra.mxu0 %v87_v37 }
  0x59   :  { %498 = vmatprep.subr.mxu0 %v102_v39 }
  0x5a   :  { %533 = vmatpush3.xpose.msra.mxu1 %v196_v42 }
  0x5b   :  { %534 = vmatprep.subr.mxu1 %v211_v44 }
  0x5c   :  { %499 = vmatpush3.xpose.msra.mxu0 %v86_v41 }
  0x5d   :  { %500 = vmatprep.subr.mxu0 %v101_v43 }
  0x5e   :  { %535 = vmatpush3.xpose.msra.mxu1 %v195_v46 }
  0x5f   :  { %536 = vmatprep.subr.mxu1 %v210_v48 }
  0x60   :  { %501 = vmatpush3.xpose.msra.mxu0 %v85_v45 }
  0x61   :  { %502 = vmatprep.subr.mxu0 %v100_v47 }
  0x62   :  { %537 = vmatpush3.xpose.msra.mxu1 %v194_v50 }
  0x63   :  { %538 = vmatprep.subr.mxu1 %v209_v52 }
  0x64   :  { %503 = vmatpush3.xpose.msra.mxu0 %v84_v49 }
  0x65   :  { %504 = vmatprep.subr.mxu0 %v99_v51 }
  0x66   :  { %539 = vmatpush3.xpose.msra.mxu1 %v193_v54 }
  0x67   :  { %540 = vmatprep.subr.mxu1 %v208_v56 }
  0x68   :  { %505 = vmatpush3.xpose.msra.mxu0 %v83_v53 }
  0x69   :  { %506 = vmatprep.subr.mxu0 %v98_v55 }
  0x6a   :  { %541 = vmatpush3.xpose.msra.mxu1 %v192_v58 }
  0x6b   :  { %542 = vmatprep.subr.mxu1 %v207_v60 }
  0x6c   :  { %507 = vmatpush3.xpose.msra.mxu0 %v82_v57 }
  0x6d   :  { %508 = vmatprep.subr.mxu0 %v97_v59 }
  0x6e   :  { %543 = vmatpush3.xpose.msra.mxu1 %v191_v62 }
  0x6f   :  { %544 = vmatprep.subr.mxu1 %v206_v63 }
  0x70   :  { %509 = vmatpush3.xpose.msra.mxu0 %v81_v61 }
  0x71   :  { %373 = vmatprep.subr.mxu0 %v372_v0 }
  0x72   :  { %545 = vmatpush3.xpose.msra.mxu1 %v190_v2 }
  0x73   :  { %511 = vmatmul.mubr.f32.vlgmr.msra.gmra.mxu0 %v762_v20  ;;  %550 = vmatprep.subr.mxu1 %v372_v0 }
  0x74   :  { %512 = vmatprep.mubr.f32.mxu0 %v80_v1  ;;  %374 = vmatpush1.xpose.msra.mxu0 %v371_v3 }
  0x75   :  { %375 = vmatprep.subr.mxu0 %v370_v4  ;;  %547 = vmatmul.mubr.f32.vlgmr.msra.gmra.mxu1 %v762_v20  ;;  %v354_v20 = vld [vmem:[#allocation9 + $0x68] sm:$0xff] }
  0x76   :  { %548 = vmatprep.mubr.f32.mxu1 %v80_v1  ;;  %566 = vmatpush1.xpose.msra.mxu1 %v371_v3 }
  0x77   :  { %513 = vmatmul.mubr.f32.gmra.mxu0 %v80_v1  ;;  %551 = vmatprep.subr.mxu1 %v370_v4 }
  0x78   :  { %376 = vmatpush1.xpose.msra.mxu0 %v369_v5 }
  0x79   :  { %377 = vmatprep.subr.mxu0 %v368_v6  ;;  %549 = vmatmul.mubr.f32.gmra.mxu1 %v80_v1 }
  0x7a   :  { %567 = vmatpush1.xpose.msra.mxu1 %v369_v5 }
  0x7b   :  { %552 = vmatprep.subr.mxu1 %v368_v6 }
  0x7c   :  { %378 = vmatpush1.xpose.msra.mxu0 %v367_v7 }
  0x7d   :  { %379 = vmatprep.subr.mxu0 %v366_v8 }
  0x7e   :  { %568 = vmatpush1.xpose.msra.mxu1 %v367_v7 }
  0x7f   :  { %553 = vmatprep.subr.mxu1 %v366_v8 }
  0x80   :  { %380 = vmatpush1.xpose.msra.mxu0 %v365_v9 }
  0x81   :  { %381 = vmatprep.subr.mxu0 %v364_v10 }
  0x82   :  { %569 = vmatpush1.xpose.msra.mxu1 %v365_v9 }
  0x83   :  { %554 = vmatprep.subr.mxu1 %v364_v10 }
  0x84   :  { %382 = vmatpush1.xpose.msra.mxu0 %v363_v11 }
  0x85   :  { %383 = vmatprep.subr.mxu0 %v362_v12 }
  0x86   :  { %570 = vmatpush1.xpose.msra.mxu1 %v363_v11 }
  0x87   :  { %555 = vmatprep.subr.mxu1 %v362_v12 }
  0x88   :  { %384 = vmatpush1.xpose.msra.mxu0 %v361_v13 }
  0x89   :  { %385 = vmatprep.subr.mxu0 %v360_v14 }
  0x8a   :  { %571 = vmatpush1.xpose.msra.mxu1 %v361_v13 }
  0x8b   :  { %556 = vmatprep.subr.mxu1 %v360_v14 }
  0x8c   :  { %386 = vmatpush1.xpose.msra.mxu0 %v359_v15 }
  0x8d   :  { %387 = vmatprep.subr.mxu0 %v358_v16 }
  0x8e   :  { %572 = vmatpush1.xpose.msra.mxu1 %v359_v15 }
  0x8f   :  { %557 = vmatprep.subr.mxu1 %v358_v16 }
  0x90   :  { %388 = vmatpush1.xpose.msra.mxu0 %v357_v17 }
  0x91   :  { %389 = vmatprep.subr.mxu0 %v356_v18 }
  0x92   :  { %573 = vmatpush1.xpose.msra.mxu1 %v357_v17 }
  0x93   :  { %558 = vmatprep.subr.mxu1 %v356_v18 }
  0x94   :  { %390 = vmatpush1.xpose.msra.mxu0 %v355_v19 }
  0x95   :  { %391 = vmatprep.subr.mxu0 %v354_v20 }
  0x96   :  { %574 = vmatpush1.xpose.msra.mxu1 %v355_v19 }
  0x97   :  { %559 = vmatprep.subr.mxu1 %v354_v20 }
  0x98   :  { %392 = vmatpush1.xpose.msra.mxu0 %v353_v21 }
  0x99   :  { %393 = vmatprep.subr.mxu0 %v352_v22 }
  0x9a   :  { %575 = vmatpush1.xpose.msra.mxu1 %v353_v21 }
  0x9b   :  { %560 = vmatprep.subr.mxu1 %v352_v22 }
  0x9c   :  { %394 = vmatpush1.xpose.msra.mxu0 %v351_v23 }
  0x9d   :  { %395 = vmatprep.subr.mxu0 %v350_v24 }
  0x9e   :  { %576 = vmatpush1.xpose.msra.mxu1 %v351_v23 }
  0x9f   :  { %561 = vmatprep.subr.mxu1 %v350_v24 }
  0xa0   :  { %396 = vmatpush1.xpose.msra.mxu0 %v349_v25 }
  0xa1   :  { %397 = vmatprep.subr.mxu0 %v348_v26 }
  0xa2   :  { %577 = vmatpush1.xpose.msra.mxu1 %v349_v25 }
  0xa3   :  { %562 = vmatprep.subr.mxu1 %v348_v26 }
  0xa4   :  { %398 = vmatpush1.xpose.msra.mxu0 %v347_v27 }
  0xa5   :  { %399 = vmatprep.subr.mxu0 %v346_v28 }
  0xa6   :  { %578 = vmatpush1.xpose.msra.mxu1 %v347_v27 }
  0xa7   :  { %563 = vmatprep.subr.mxu1 %v346_v28 }
  0xa8   :  { %400 = vmatpush1.xpose.msra.mxu0 %v345_v29 }
  0xa9   :  { %401 = vmatprep.subr.mxu0 %v344_v30 }
  0xaa   :  { %579 = vmatpush1.xpose.msra.mxu1 %v345_v29 }
  0xab   :  { %564 = vmatprep.subr.mxu1 %v344_v30 }
  0xac   :  { %402 = vmatpush1.xpose.msra.mxu0 %v343_v31 }
  0xad   :  { %403 = vmatprep.subr.mxu0 %v342_v32 }
  0xae   :  { %580 = vmatpush1.xpose.msra.mxu1 %v343_v31 }
  0xaf   :  { %565 = vmatprep.subr.mxu1 %v342_v32 }
  0xb0   :  { %404 = vmatpush1.xpose.msra.mxu0 %v341_v33 }
  0xb2   :  { %581 = vmatpush1.xpose.msra.mxu1 %v341_v33 }
 0x133   :  { %v179_v34 = vpop.f32.mrf.mxu0 }
 0x134   :  { %v303_v35 = vmul.f32 0.044715, %v179_v34  ;;  %v299_v62 = vmul.f32 0.5, %v179_v34 }
 0x135   :  { %v181_v36 = vpop.f32.mrf.mxu0  ;;  %v288_v58 = vpop.f32.mrf.mxu1 }
 0x136   :  { %v307_v37 = vmul.f32 %v303_v35, %v179_v34  ;;  %v304_v38 = vmul.f32 0.044715, %v181_v36  ;;  %v300_v0 = vmul.f32 0.5, %v181_v36 }
 0x137   :  { %v185_v39 = vpop.f32.mrf.mxu0  ;;  %v290_v63 = vpop.f32.mrf.mxu1 }
 0x138   :  { %v311_v40 = vmul.f32 %v307_v37, %v179_v34  ;;  %v308_v41 = vmul.f32 %v304_v38, %v181_v36  ;;  %v305_v42 = vmul.f32 0.044715, %v185_v39  ;;  %v301_v8 = vmul.f32 0.5, %v185_v39 }
 0x139   :  { %v187_v43 = vpop.f32.mrf.mxu0  ;;  %v294_v7 = vpop.f32.mrf.mxu1 }
 0x13a   :  { %v315_v44 = vadd.f32 %v311_v40, %v179_v34  ;;  %v312_v45 = vmul.f32 %v308_v41, %v181_v36  ;;  %v309_v46 = vmul.f32 %v305_v42, %v185_v39  ;;  %v306_v47 = vmul.f32 0.044715, %v187_v43 }
 0x13b   :  { %v302_v10 = vmul.f32 0.5, %v187_v43  ;;  %v296_v15 = vpop.f32.mrf.mxu1 }
 0x13c   :  { %v316_v48 = vadd.f32 %v312_v45, %v181_v36  ;;  %v313_v49 = vmul.f32 %v309_v46, %v185_v39  ;;  %v310_v50 = vmul.f32 %v306_v47, %v187_v43  ;;  %v319_v51 = vmul.f32 0.7978846, %v315_v44 }
 0x13e   :  { %v317_v52 = vadd.f32 %v313_v49, %v185_v39  ;;  %v314_v53 = vmul.f32 %v310_v50, %v187_v43  ;;  %591 = vtanh.f32 %v319_v51  ;;  %v320_v54 = vmul.f32 0.7978846, %v316_v48 }
 0x140   :  { %v318_v55 = vadd.f32 %v314_v53, %v187_v43  ;;  %593 = vtanh.f32 %v320_v54  ;;  %v321_v56 = vmul.f32 0.7978846, %v317_v52 }
 0x142   :  { %595 = vtanh.f32 %v321_v56  ;;  %v322_v57 = vmul.f32 0.7978846, %v318_v55 }
 0x144   :  { %597 = vtanh.f32 %v322_v57 }
 0x14b   :  { %v592_v59 = vpop.eup %591 }
 0x14c   :  { %v327_v60 = vadd.f32 1.0, %v592_v59 }
 0x14d   :  { %v594_v61 = vpop.eup %593 }
 0x14e   :  { %v328_v1 = vadd.f32 1.0, %v594_v61  ;;  %v331_v3 = vmul.f32 %v327_v60, %v299_v62 }
 0x14f   :  { %v596_v2 = vpop.eup %595 }
 0x150   :  { %v332_v4 = vmul.f32 %v328_v1, %v300_v0  ;;  %v329_v5 = vadd.f32 1.0, %v596_v2  ;;  %v335_v12 = vmul.f32 %v331_v3, %v288_v58 }
 0x151   :  { %v598_v6 = vpop.eup %597 }
 0x152   :  { %v336_v9 = vmul.f32 %v332_v4, %v290_v63  ;;  %v330_v11 = vadd.f32 1.0, %v598_v6  ;;  %v333_v13 = vmul.f32 %v329_v5, %v301_v8 }
 0x154   :  { %v334_v14 = vmul.f32 %v330_v11, %v302_v10  ;;  %437 = vmatprep.mubr.f32.mxu0 %v336_v9  ;;  %v337_v17 = vmul.f32 %v333_v13, %v294_v7 }
 0x155   :  { %438 = vmatmul.mubr.f32.vlgmr.msra.gmra.mxu0 %v335_v12 }
 0x156   :  { %v338_v16 = vmul.f32 %v334_v14, %v296_v15 }
 0x158   :  { %442 = vmatprep.mubr.f32.mxu1 %v338_v16 }
 0x159   :  { %443 = vmatmul.mubr.f32.vlgmr.msra.gmra.mxu1 %v337_v17 }
 0x215   :  { %v439_v18 = vpop.f32.mrf.mxu0 }
 0x216   :  { %457 = vst [vmem:[#allocation11] sm:$0xff] %v439_v18 }
 0x217   :  { %v441_v19 = vpop.f32.mrf.mxu0 }
 0x219   :  { %v444_v20 = vpop.f32.mrf.mxu1 }
 0x21a   :  { %458 = vst [vmem:[#allocation11 + $0x8] sm:$0xff] %v444_v20 }
 0x21b   :  { %v446_v21 = vpop.f32.mrf.mxu1 }
 0x21c   :  { %690 = shalt.err (!%p687_p10)
}
 0x21d   :  { %470 = dma.vmem_to_hbm [thread:$0]  %s465_s3, 256, %s778_s4, [#allocation5], %s709_s20, %s709_s20, %s710_s21  }
 0x21e   :  { %705 = dma.done.wait [#allocation5], 256  }
 0x21f   :  { %706 = vsyncadd [#allocation5], 4294967040 }
 0x220   :  { %474 = vsyncpa [#allocation4], 1 }
 0x221   :  { %475 = vsyncpa [#allocation7], 1 }
 0x222   :  { %476 = vsyncpa [#allocation10], 1 }
 0x223   :  { %477 = vsyncpa [#allocation5], 1 }

</bundles_post_ra>
